<compile_context>
chip_gen: v6e
topology: v6e:2x2x1
jax: 0.10.0
libtpu: 0.0.40
codegen_flags: <defaults>
</compile_context>

<pallas_src>
import jax
import jax.numpy as jnp
from jax.experimental import pallas as pl
from jax.experimental.pallas import tpu as pltpu


def _matching_kernel(temp_ref, s_ref, d_ref, o_ref):
    # temp_ref: SMEM (1,) f32 scalar-prefetch (temperature parameter)
    # s_ref: (BB, TM, D)  d_ref: (BB, D, N)  o_ref: (BB, TM, N)   all VMEM, f32
    inv_t = 1.0 / temp_ref[0]

    # bf16 operands, f32 MXU accumulation.
    s = s_ref[...].astype(jnp.bfloat16)
    d = d_ref[...].astype(jnp.bfloat16)
    scores = jnp.einsum(
        "bmd,bdn->bmn", s, d, preferred_element_type=jnp.float32
    ) * inv_t

    # Numerically-stable softmax over the last axis (rows are independent, so
    # M-tiling / padded edge rows never contaminate valid rows).
    m = jnp.max(scores, axis=-1, keepdims=True)
    e = jnp.exp(scores - m)
    denom = jnp.sum(e, axis=-1, keepdims=True)
    probs = e * pl.reciprocal(denom, approx=True)   # EUP slot, ~1e-3 rel. error
    o_ref[...] = probs.astype(o_ref.dtype)


def _choose_tiles(B, M, D, N, itemsize=4, budget_bytes=12 * 1024 * 1024):
    """Pick (batch-group BB, M-tile TM) so the double-buffered working set fits
    the scoped-VMEM default on every TPU generation."""

    def working_set(bb, tm):
        # 2x for double-buffered input/output blocks.
        return 2 * bb * (tm * D + D * N + tm * N) * itemsize

    # M tile: full M when small (no (8,128) constraint for full dims),
    # otherwise an MXU-friendly 256 tile, shrunk (8-aligned) until it fits.
    TM = M if M <= 256 else 256
    while TM > 8 and working_set(1, TM) > budget_bytes:
        TM = max(8, ((TM // 2) + 7) // 8 * 8)

    # Batch group: amortize the per-grid-step overhead when per-batch work is
    # small; capped at 8 and at the VMEM budget.
    BB = 1
    while BB < min(B, 8) and working_set(BB + 1, TM) <= budget_bytes:
        BB += 1
    return BB, TM


def many_to_one_matching(sparse_features, dense_features, temperature, dustbin):
    """Pallas implementation of ManyToOneMatching.forward.

    sparse_features: (B, M, D) f32
    dense_features : (B, D, N) f32
    temperature    : scalar f32 parameter
    dustbin        : (1, D, D) f32 parameter (dead code in the original forward;
                     kept for parameter parity, unused by the computation)
    returns        : (B, M, N) f32 softmax probabilities
    """
    del dustbin  # unused by the original forward's output (cat result is discarded)
    B, M, D = sparse_features.shape
    Bd, Dd, N = dense_features.shape
    assert B == Bd and D == Dd

    BB, TM = _choose_tiles(B, M, D, N)
    grid = (pl.cdiv(B, BB), pl.cdiv(M, TM))

    temp = jnp.asarray(temperature, jnp.float32).reshape((1,))

    grid_spec = pltpu.PrefetchScalarGridSpec(
        num_scalar_prefetch=1,
        grid=grid,
        in_specs=[
            # sparse tile: varies with both grid axes
            pl.BlockSpec((BB, TM, D), lambda bg, mt, temp_ref: (bg, mt, 0)),
            # dense block: constant across the inner M-tile axis -> stays resident
            pl.BlockSpec((BB, D, N), lambda bg, mt, temp_ref: (bg, 0, 0)),
        ],
        out_specs=pl.BlockSpec((BB, TM, N), lambda bg, mt, temp_ref: (bg, mt, 0)),
    )

    return pl.pallas_call(
        _matching_kernel,
        out_shape=jax.ShapeDtypeStruct((B, M, N), jnp.float32),
        grid_spec=grid_spec,
        compiler_params=pltpu.CompilerParams(
            # Both axes produce independent output blocks -> both parallel
            # (lets v7x shard grid steps across its 2 TensorCores).
            dimension_semantics=("parallel", "parallel"),
            # Safe on v5e/v6e (128 MiB physical) and v7x (64 MiB physical);
            # raises v5e's 16 MiB default.
            vmem_limit_bytes=32 * 1024 * 1024,
        ),
    )(temp, sparse_features, dense_features)


if __name__ == "__main__":
    key = jax.random.PRNGKey(0)
    k_sparse, k_dense, k_dustbin = jax.random.split(key, 3)

    # Small, module-consistent shapes.
    B, M, feature_dim = 2, 8, 32
    D = N = feature_dim

    sparse_features = jax.random.normal(k_sparse, (B, M, D), dtype=jnp.float32)
    dense_features = jax.random.normal(k_dense, (B, D, N), dtype=jnp.float32)

    # Deterministic parameter init (mirrors __init__: temperature scalar, dustbin randn).
    temperature = jnp.float32(0.1)
    dustbin = jax.random.normal(
        k_dustbin, (1, feature_dim, feature_dim), dtype=jnp.float32
    )

    out = many_to_one_matching(sparse_features, dense_features, temperature, dustbin)
    out = jax.block_until_ready(out)

    # Reference with matched matmul precision (bf16 operands, f32 accumulation —
    # same as the in-kernel MXU path) so the check stays tight despite the bf16
    # cast; tolerance covers the approx-reciprocal (~1e-3 relative) in softmax.
    sb = sparse_features.astype(jnp.bfloat16)
    db = dense_features.astype(jnp.bfloat16)
    scores_ref = (
        jnp.einsum("bmd,bdn->bmn", sb, db, preferred_element_type=jnp.float32)
        / temperature
    )
    ref = jax.nn.softmax(scores_ref, axis=-1)

    assert out.shape == (B, M, N)
    assert bool(jnp.allclose(out, ref, atol=1e-2, rtol=1e-2))

    print("KERNEL_OK")
</pallas_src>

<mosaic_0001>
module attributes {stable_mosaic.version = 11 : i64} {
  func.func @_matching_kernel(%arg0: i32, %arg1: i32, %arg2: memref<1xf32, #tpu.memory_space<smem>>, %arg3: memref<2x8x32xf32, #tpu.memory_space<vmem>>, %arg4: memref<2x32x32xf32, #tpu.memory_space<vmem>>, %arg5: memref<2x8x32xf32, #tpu.memory_space<vmem>>) attributes {dimension_semantics = [#tpu.dimension_semantics<parallel>, #tpu.dimension_semantics<parallel>], iteration_bounds = array<i64: 1, 1>, scalar_prefetch = 1 : i64, scratch_operands = 0 : i64, tpu.core_type = #tpu.core_type<tc>, window_params = [{transform_indices = @transform_0, window_bounds = array<i64: 2, 8, 32>}, {transform_indices = @transform_1, window_bounds = array<i64: 2, 32, 32>}, {transform_indices = @transform_2, window_bounds = array<i64: 2, 8, 32>}]} {
    %c0 = arith.constant 0 : index
    %0 = memref.load %arg2[%c0] : memref<1xf32, #tpu.memory_space<smem>>
    %cst = arith.constant 1.000000e+00 : f32
    %1 = arith.divf %cst, %0 : f32
    %c0_0 = arith.constant 0 : index
    %c0_1 = arith.constant 0 : index
    %c0_2 = arith.constant 0 : index
    %2 = vector.load %arg3[%c0_0, %c0_1, %c0_2] : memref<2x8x32xf32, #tpu.memory_space<vmem>>, vector<2x8x32xf32>
    %3 = arith.truncf %2 : vector<2x8x32xf32> to vector<2x8x32xbf16>
    %c0_3 = arith.constant 0 : index
    %c0_4 = arith.constant 0 : index
    %c0_5 = arith.constant 0 : index
    %4 = vector.load %arg4[%c0_3, %c0_4, %c0_5] : memref<2x32x32xf32, #tpu.memory_space<vmem>>, vector<2x32x32xf32>
    %5 = arith.truncf %4 : vector<2x32x32xf32> to vector<2x32x32xbf16>
    "tpu.trace_start"() <{level = 10 : i32, message = "bmd,bdn->bmn"}> : () -> ()
    %cst_6 = arith.constant dense<0.000000e+00> : vector<2x8x32xf32>
    %6 = tpu.matmul %3, %5, %cst_6 {dimension_numbers = #tpu.dot_dimension_numbers<[2], [1], [1], [2], [0, 0, 0, 1, 1, 2], [0], [0]>} : vector<2x8x32xbf16>, vector<2x32x32xbf16>, vector<2x8x32xf32> -> vector<2x8x32xf32>
    "tpu.trace_stop"() : () -> ()
    %7 = vector.broadcast %1 : f32 to vector<2x8x32xf32>
    %8 = arith.mulf %6, %7 : vector<2x8x32xf32>
    %cst_7 = arith.constant dense<0xFF800000> : vector<2x8xf32>
    %9 = vector.multi_reduction <maximumf>, %8, %cst_7 [2] : vector<2x8x32xf32> to vector<2x8xf32>
    %10 = vector.shape_cast %9 : vector<2x8xf32> to vector<2x8x1xf32>
    %11 = vector.broadcast %10 : vector<2x8x1xf32> to vector<2x8x32xf32>
    %12 = arith.subf %8, %11 : vector<2x8x32xf32>
    %13 = math.exp %12 : vector<2x8x32xf32>
    %cst_8 = arith.constant dense<0.000000e+00> : vector<2x8xf32>
    %14 = vector.multi_reduction <add>, %13, %cst_8 [2] : vector<2x8x32xf32> to vector<2x8xf32>
    %15 = vector.shape_cast %14 : vector<2x8xf32> to vector<2x8x1xf32>
    %16 = tpu.reciprocal %15 {approx = true} : vector<2x8x1xf32> -> vector<2x8x1xf32>
    %17 = vector.broadcast %16 : vector<2x8x1xf32> to vector<2x8x32xf32>
    %18 = arith.mulf %13, %17 : vector<2x8x32xf32>
    %c0_9 = arith.constant 0 : index
    %c0_10 = arith.constant 0 : index
    %c0_11 = arith.constant 0 : index
    %19 = vector.load %arg5[%c0_9, %c0_10, %c0_11] : memref<2x8x32xf32, #tpu.memory_space<vmem>>, vector<2x8x32xf32>
    tpu.vector_store %arg5[%c0_9, %c0_10, %c0_11], %18 {strides = array<i32>} : memref<2x8x32xf32, #tpu.memory_space<vmem>>, vector<2x8x32xf32>,
    return
  }
  func.func @transform_0(%arg0: i32, %arg1: i32, %arg2: memref<1xf32, #tpu.memory_space<smem>>) -> (i32, i32, i32) {
    %c0_i32 = arith.constant 0 : i32
    %c0_i32_0 = arith.constant 0 : i32
    return %arg0, %arg1, %c0_i32 : i32, i32, i32
  }
  func.func @transform_1(%arg0: i32, %arg1: i32, %arg2: memref<1xf32, #tpu.memory_space<smem>>) -> (i32, i32, i32) {
    %c0_i32 = arith.constant 0 : i32
    %c0_i32_0 = arith.constant 0 : i32
    %c0_i32_1 = arith.constant 0 : i32
    return %arg0, %c0_i32, %c0_i32_0 : i32, i32, i32
  }
  func.func @transform_2(%arg0: i32, %arg1: i32, %arg2: memref<1xf32, #tpu.memory_space<smem>>) -> (i32, i32, i32) {
    %c0_i32 = arith.constant 0 : i32
    %c0_i32_0 = arith.constant 0 : i32
    return %arg0, %arg1, %c0_i32 : i32, i32, i32
  }
}

</mosaic_0001>

<bundles_post_ra>
// kernel: tpu_custom_call.1
= control target key start
LH: loop header
LB: loop body
LE: loop exit
PB: predicated region body
PF: predicated region fallthrough
CT: control target
= control target key end

     0   :  { %9 = vsyncpa [#allocation5], 0  ;;  %s360_s0 = inlined_call_operand.<no memory space> [shape: f32[1], index: 0, kind: input, shape index: {}]   ;;  %s361_s1 = inlined_call_operand.hbm [shape: f32[2,8,32], index: 1, kind: input, shape index: {}]   ;;  %s362_s2 = inlined_call_operand.hbm [shape: f32[2,32,32], index: 2, kind: input, shape index: {}]   ;;  %s363_s3 = inlined_call_operand.hbm [shape: f32[2,8,32], index: 3, kind: output, shape index: {}]  }
   0x1   :  { %10 = vsyncpa [#allocation8], 0 }
   0x2   :  { %11 = vsyncpa [#allocation6], 0  ;;  %s304_s12 = smov [#allocation4]  }
   0x3   :  { %s17_s13 = sshll.u32 %s304_s12, 4  ;;  %s18_s13 = int_to_ptr.vmem [resolvable:$true] %s17_s13 }
   0x4   :  { %s246_s14 = scalar_lea.vmem %s18_s13, 256  ;;  %p251_p1 = scmp.lt.s32.totalorder %s18_s13, %s18_s13 }
   0x5   :  { %p247_p0 = scmp.ne.s32.totalorder %s18_s13, %s246_s14  ;;  %p252_p2 = scmp.lt.s32.totalorder %s246_s14, %s246_s14 }
   0x7   :  { %p253_p3 = por %p252_p2, %p251_p1 }
   0x9   :  { %p254_p4 = pnand %p253_p3, %p247_p0 }
   0xb   :  { %257 = shalt.err (!%p254_p4)
}
   0xc   :  { %s305_s15 = smov 128   ;;  %s306_s16 = smov 8  }
   0xd   :  { %23 = dma.hbm_to_vmem [thread:$0]  %s361_s1, 256, %s18_s13, [#allocation5], %s305_s15, %s305_s15, %s306_s16  }
   0xe   :  { %s307_s19 = smov [#allocation7]  }
   0xf   :  { %s29_s20 = sshll.u32 %s307_s19, 4  ;;  %s30_s20 = int_to_ptr.vmem [resolvable:$true] %s29_s20 }
  0x10   :  { %s266_s21 = scalar_lea.vmem %s30_s20, 1024  ;;  %p271_p6 = scmp.lt.s32.totalorder %s30_s20, %s30_s20 }
  0x11   :  { %p267_p5 = scmp.ne.s32.totalorder %s30_s20, %s266_s21  ;;  %p272_p7 = scmp.lt.s32.totalorder %s266_s21, %s266_s21 }
  0x13   :  { %p273_p8 = por %p272_p7, %p271_p6 }
  0x15   :  { %p274_p9 = pnand %p273_p8, %p267_p5 }
  0x17   :  { %277 = shalt.err (!%p274_p9)
}
  0x18   :  { %35 = dma.hbm_to_vmem [thread:$0]  %s362_s2, 1024, %s30_s20, [#allocation8], %s305_s15, %s305_s15, %s306_s16  }
  0x19   :  { %298 = dma.done.wait [#allocation5], 256  }
  0x1a   :  { %299 = vsyncadd [#allocation5], 4294967040 }
  0x1b   :  { %300 = dma.done.wait [#allocation8], 1024  }
  0x1c   :  { %301 = vsyncadd [#allocation8], 4294966272  ;;  %v44_v0 = vstv %s360_s0  ;;  %v308_v1 = vmov 0.0   ;;  %vm309_vm0 = vmmov 0   ;;  %v53_v2 = vld [vmem:[#allocation7 + $0x10] sm:$0xff]  ;;  %v54_v3 = vld [vmem:[#allocation7 + $0x18] sm:$0xff] }
  0x1d   :  { %203 = vmatprep.subr.bf16.mxu0 %v308_v1  ;;  %211 = vmatprep.subr.bf16.mxu1 %v308_v1  ;;  %228 = vrcp.f32 %v44_v0  ;;  %v57_v4 = vld [vmem:[#allocation7 + $0x30] sm:$0xff]  ;;  %v60_v5 = vpack.c.bf16 %v54_v3, %v53_v2  ;;  %v58_v6 = vld [vmem:[#allocation7 + $0x38] sm:$0xff]  ;;  %v51_v7 = vld [vmem:[#allocation7] sm:$0xff]  ;;  %vm63_vm1 = vcmask 261120   ;;  %s310_s2 = smov [#allocation9]  }
  0x1e   :  { %207 = vmatprep.mubr.msk.bf16.mxu0 %vm309_vm0, %v308_v1  ;;  %215 = vmatprep.mubr.msk.bf16.mxu1 %vm309_vm0, %v308_v1  ;;  %v52_v8 = vld [vmem:[#allocation7 + $0x8] sm:$0xff]  ;;  %v62_v9 = vpack.c.bf16 %v58_v6, %v57_v4  ;;  %v55_v10 = vld [vmem:[#allocation7 + $0x20] sm:$0xff]  ;;  %v47_v13 = vld [vmem:[#allocation4] sm:$0xff]  ;;  %s182_s25 = sshll.u32 %s310_s2, 4  ;;  %s183_s25 = int_to_ptr.vmem [resolvable:$true] %s182_s25 }
  0x1f   :  { %v56_v11 = vld [vmem:[#allocation7 + $0x28] sm:$0xff]  ;;  %204 = vmatpush3.bf16.msra.mxu0 %v60_v5  ;;  %v59_v12 = vpack.c.bf16 %v52_v8, %v51_v7  ;;  %v48_v15 = vld [vmem:[#allocation4 + $0x8] sm:$0xff]  ;;  %v49_v16 = vpack.c.bf16 %v47_v13, %v47_v13  ;;  %s278_s26 = scalar_lea.vmem %s183_s25, 256  ;;  %p283_p11 = scmp.lt.s32.totalorder %s183_s25, %s183_s25 }
  0x20   :  { %212 = vmatpush3.bf16.msra.mxu1 %v62_v9  ;;  %205 = vmatprep.subr.bf16.mxu0 %v308_v1  ;;  %v61_v14 = vpack.c.bf16 %v56_v11, %v55_v10  ;;  %v50_v18 = vpack.c.bf16 %v48_v15, %v48_v15  ;;  %p279_p10 = scmp.ne.s32.totalorder %s183_s25, %s278_s26  ;;  %p284_p12 = scmp.lt.s32.totalorder %s278_s26, %s278_s26 }
  0x21   :  { %213 = vmatprep.subr.bf16.mxu1 %v308_v1 }
  0x22   :  { %p285_p13 = por %p284_p12, %p283_p11 }
  0x23   :  { %206 = vmatpush3.bf16.msra.mxu0 %v59_v12 }
  0x24   :  { %214 = vmatpush3.bf16.msra.mxu1 %v61_v14  ;;  %p286_p0 = pnand %p285_p13, %p279_p10 }
  0x26   :  { %208 = vmatmul.mubr.msk.bf16.vlgmr.msra.gmra.mxu0 %vm63_vm1, %v49_v16 }
  0x27   :  { %216 = vmatmul.mubr.msk.bf16.vlgmr.msra.gmra.mxu1 %vm63_vm1, %v50_v18 }
  0x2a   :  { %v229_v17 = vpop.eup %228 }
  0x2b   :  { %219 = vpush %v229_v17 }
  0x5c   :  { %s220_s0 = spop %219 }
  0x5d   :  { %v150_v19 = vstv %s220_s0 }
  0xe6   :  { %v101_v20 = vpop.f32.mrf.mxu0 }
  0xe7   :  { %v151_v21 = vmul.f32 %v150_v19, %v101_v20  ;;  %v144_v22 = vpop.f32.mrf.mxu1 }
  0xe8   :  { %v209_v23 = vpop.f32.mrf.mxu0  ;;  %v152_v24 = vmul.f32 %v150_v19, %v144_v22 }
  0xe9   :  { %v217_v25 = vpop.f32.mrf.mxu1  ;;  %v153_v26 = vsel %vm63_vm1, %v151_v21, -inf }
  0xea   :  { %154 = vmax.xlane.f32.xlu0 %v153_v26  ;;  %v104_v27 = vpop.f32.mrf.mxu0  ;;  %v156_v31 = vsel %vm63_vm1, %v152_v24, -inf }
  0xeb   :  { %v147_v28 = vpop.f32.mrf.mxu1 }
  0xec   :  { %v210_v29 = vpop.f32.mrf.mxu0 }
  0xed   :  { %v218_v30 = vpop.f32.mrf.mxu1 }
  0xee   :  { %157 = vmax.xlane.f32.xlu0 %v156_v31 }
 0x173   :  { %v155_v32 = vpop.xlane.xlu0 %154 }
 0x174   :  { %v159_v33 = vsub.f32 %v151_v21, %v155_v32 }
 0x176   :  { %v161_v34 = vmul.f32 1.442695, %v159_v33 }
 0x177   :  { %v158_v35 = vpop.xlane.xlu0 %157 }
 0x178   :  { %230 = vpow2.f32 %v161_v34  ;;  %v160_v36 = vsub.f32 %v152_v24, %v158_v35 }
 0x17a   :  { %v163_v37 = vmul.f32 1.442695, %v160_v36 }
 0x17c   :  { %232 = vpow2.f32 %v163_v37 }
 0x185   :  { %v231_v38 = vpop.eup %230 }
 0x186   :  { %v165_v39 = vsel %vm63_vm1, %v231_v38, 0.0 }
 0x187   :  { %166 = vadd.xlane.f32.xlu1 %v165_v39 }
 0x189   :  { %v233_v40 = vpop.eup %232 }
 0x18a   :  { %v168_v41 = vsel %vm63_vm1, %v233_v40, 0.0 }
 0x18b   :  { %169 = vadd.xlane.f32.xlu1 %v168_v41 }
 0x210   :  { %v167_v42 = vpop.xlane.xlu1 %166 }
 0x211   :  { %234 = vrcp.f32 %v167_v42 }
 0x214   :  { %v170_v43 = vpop.xlane.xlu1 %169 }
 0x215   :  { %236 = vrcp.f32 %v170_v43 }
 0x21e   :  { %v235_v44 = vpop.eup %234 }
 0x21f   :  { %v173_v45 = vmul.f32 %v235_v44, %v231_v38 }
 0x221   :  { %175 = vst.msk [vmem:[#allocation9] sm:$0xff] %vm63_vm1, %v173_v45 }
 0x222   :  { %v237_v46 = vpop.eup %236 }
 0x223   :  { %v174_v47 = vmul.f32 %v237_v46, %v233_v40 }
 0x225   :  { %176 = vst.msk [vmem:[#allocation9 + $0x8] sm:$0xff] %vm63_vm1, %v174_v47 }
 0x226   :  { %289 = shalt.err (!%p286_p0)
}
 0x227   :  { %188 = dma.vmem_to_hbm [thread:$0]  %s183_s25, 256, %s363_s3, [#allocation6], %s305_s15, %s305_s15, %s306_s16  }
 0x228   :  { %302 = dma.done.wait [#allocation6], 256  }
 0x229   :  { %303 = vsyncadd [#allocation6], 4294967040 }
 0x22a   :  { %192 = vsyncpa [#allocation5], 1 }
 0x22b   :  { %193 = vsyncpa [#allocation8], 1 }
 0x22c   :  { %194 = vsyncpa [#allocation6], 1 }

</bundles_post_ra>
